<compile_context>
chip_gen: v5e
topology: v5e:2x2
jax: 0.10.0
libtpu: 0.0.40
codegen_flags: <defaults>
</compile_context>

<pallas_src>
import jax
import jax.numpy as jnp
from jax.experimental import pallas as pl
from jax.experimental.pallas import tpu as pltpu


def embed64_kernel(x_ref, w1_ref, b1_ref, w2_ref, b2_ref, out_ref, acc_ref):
    # grid = (batch_tiles [parallel], hw_tiles [arbitrary / reduction])
    s = pl.program_id(1)
    n_s = pl.num_programs(1)

    @pl.when(s == 0)
    def _init():
        acc_ref[...] = jnp.zeros_like(acc_ref)

    x = x_ref[...]                       # (Bt, C, HWt) f32, HW on lanes
    c_dim = x.shape[1]

    # 1x1 conv (channel normalize already folded into w1/b1) as C unrolled
    # broadcast-FMAs on the VPU: contraction depth C is tiny, the MXU would be
    # ~97% idle for this step and we keep its slot free.
    h = w1_ref[0][None, :, :] * x[:, 0:1, :]             # (1,K,1)*(Bt,1,HWt)
    for c in range(1, c_dim):                            # static unroll, C small
        h = h + w1_ref[c][None, :, :] * x[:, c:c + 1, :]
    h = jnp.maximum(h + b1_ref[...][None, :, :], 0.0)    # bias + ReLU, (Bt,K,HWt)

    # partial global-sum-pool over this HW tile (1/HW folded into w2)
    acc_ref[...] += jnp.sum(h, axis=-1)                  # (Bt, K)

    # last HW tile: project to the (lane-padded) embedding and L2-normalize
    @pl.when(s == n_s - 1)
    def _finalize():
        emb = jnp.dot(acc_ref[...], w2_ref[...],
                      preferred_element_type=jnp.float32) + b2_ref[...]  # (Bt, Ep)
        inv_norm = jax.lax.rsqrt(
            jnp.sum(emb * emb, axis=-1, keepdims=True) + 1e-12)
        out_ref[...] = emb * inv_norm


def embed64_forward(x_nchw, mean, std, w1, b1, w2, b2,
                    *, hw_tile=None, batch_tile=None):
    """x_nchw: (B, C, H, W) float32  ->  (B, 64) float32 L2-normalized embedding."""
    B, C, H, W = x_nchw.shape
    HW = H * W
    K = w1.shape[1]
    E = w2.shape[1]
    Ep = ((E + 127) // 128) * 128        # pad embedding to full 128-lane stores

    # ---- tile selection --------------------------------------------------
    if batch_tile is None:
        batch_tile = 8 if (B % 8 == 0) else B        # out block: 8-aligned or full B
    assert B % batch_tile == 0, "batch_tile must divide B"
    if hw_tile is None:
        if HW % 128 == 0:
            # Largest power-of-two multiple of 128 that divides HW while keeping
            # the double-buffered x slab well inside v7x's 64 MiB VMEM.
            hw_tile = 128
            max_blk_bytes = 2 * 1024 * 1024          # per-buffer x slab budget
            while (HW % (hw_tile * 2) == 0
                   and batch_tile * C * (hw_tile * 2) * 4 <= max_blk_bytes):
                hw_tile *= 2
        else:
            hw_tile = HW
    assert HW % hw_tile == 0, "hw_tile must divide H*W (no padded spatial positions)"

    # ---- fold transform + pooling scale into the weights (exact) ----------
    f32 = jnp.float32
    istd = 1.0 / std.astype(f32)                                   # (C,)
    w1f = w1.astype(f32) * istd[:, None]                           # (C, K)
    b1f = b1.astype(f32) - (mean.astype(f32) * istd) @ w1.astype(f32)  # (K,)
    w1_3 = w1f.reshape(C, K, 1)                                    # column layout
    b1_2 = b1f.reshape(K, 1)
    w2p = jnp.zeros((K, Ep), f32).at[:, :E].set(w2.astype(f32) / HW)
    b2p = jnp.zeros((1, Ep), f32).at[0, :E].set(b2.astype(f32))

    # NCHW -> (B, C, HW): a FREE reshape (no HBM transpose pass);
    # HW lands on the 128-lane axis, C on sublanes.
    x = x_nchw.reshape(B, C, HW).astype(f32)

    grid = (B // batch_tile, HW // hw_tile)

    grid_spec = pltpu.PrefetchScalarGridSpec(
        num_scalar_prefetch=0,
        grid=grid,
        in_specs=[
            pl.BlockSpec((batch_tile, C, hw_tile), lambda b, s: (b, 0, s)),  # x
            pl.BlockSpec((C, K, 1), lambda b, s: (0, 0, 0)),                 # w1 folded
            pl.BlockSpec((K, 1),    lambda b, s: (0, 0)),                    # b1 folded
            pl.BlockSpec((K, Ep),   lambda b, s: (0, 0)),                    # w2 (/HW, padded)
            pl.BlockSpec((1, Ep),   lambda b, s: (0, 0)),                    # b2 (padded)
        ],
        out_specs=pl.BlockSpec((batch_tile, Ep), lambda b, s: (b, 0)),
        scratch_shapes=[pltpu.VMEM((batch_tile, K), jnp.float32)],
    )

    out_padded = pl.pallas_call(
        embed64_kernel,
        out_shape=jax.ShapeDtypeStruct((B, Ep), jnp.float32),
        grid_spec=grid_spec,
        compiler_params=pltpu.CompilerParams(
            dimension_semantics=("parallel", "arbitrary")),
    )(x, w1_3, b1_2, w2p, b2p)

    return out_padded[:, :E]


def embed64_reference(x_nchw, mean, std, w1, b1, w2, b2):
    """Pure-JAX reference of the same synthetic Embed64Wrapper forward."""
    B, C, H, W = x_nchw.shape
    x = jnp.transpose(x_nchw, (0, 2, 3, 1)).reshape(B, H * W, C)
    xn = (x - mean.reshape(1, 1, C)) / std.reshape(1, 1, C)
    h = jnp.maximum(jnp.einsum("bsc,ck->bsk", xn, w1) + b1, 0.0)
    pooled = jnp.mean(h, axis=1)
    emb = pooled @ w2 + b2
    return emb / jnp.sqrt(jnp.sum(emb * emb, axis=-1, keepdims=True) + 1e-12)


if __name__ == "__main__":
    B, C, H, W = 2, 4, 16, 16      # small synthetic "image" batch
    K, E = 32, 64                  # hidden width, embedding dim (Embed64)

    key = jax.random.PRNGKey(0)
    kx, kw1, kb1, kw2, kb2 = jax.random.split(key, 5)

    x = jax.random.normal(kx, (B, C, H, W), dtype=jnp.float32)

    # deterministic synthetic parameters
    mean = jnp.linspace(0.1, 0.4, C, dtype=jnp.float32)
    std = jnp.linspace(0.5, 0.8, C, dtype=jnp.float32)
    w1 = jax.random.normal(kw1, (C, K), dtype=jnp.float32) * 0.2
    b1 = jax.random.normal(kb1, (K,), dtype=jnp.float32) * 0.05
    w2 = jax.random.normal(kw2, (K, E), dtype=jnp.float32) * 0.1
    b2 = jax.random.normal(kb2, (E,), dtype=jnp.float32) * 0.05

    # TODO(synk): the real image_encoder/transform are opaque nn.Modules; this
    # synthetic normalize + 1x1-conv + pool + linear head stands in for them.

    # hw_tile=128 -> 2 HW-reduction grid steps at this small demo size, so the
    # accumulator / pl.when-finalize path is actually exercised.
    out = embed64_forward(x, mean, std, w1, b1, w2, b2, hw_tile=128)
    out = jax.block_until_ready(out)

    ref = embed64_reference(x, mean, std, w1, b1, w2, b2)
    assert out.shape == (B, E)
    assert jnp.allclose(out, ref, atol=1e-4, rtol=1e-4), (
        "mismatch vs reference: max abs diff "
        f"{float(jnp.max(jnp.abs(out - ref)))}")

    print("KERNEL_OK")
</pallas_src>

<mosaic_0001>
module attributes {stable_mosaic.version = 11 : i64} {
  func.func @embed64_kernel(%arg0: i32, %arg1: i32, %arg2: memref<2x4x128xf32, #tpu.memory_space<vmem>>, %arg3: memref<4x32x1xf32, #tpu.memory_space<vmem>>, %arg4: memref<32x1xf32, #tpu.memory_space<vmem>>, %arg5: memref<32x128xf32, #tpu.memory_space<vmem>>, %arg6: memref<1x128xf32, #tpu.memory_space<vmem>>, %arg7: memref<2x128xf32, #tpu.memory_space<vmem>>, %arg8: memref<2x32xf32, #tpu.memory_space<vmem>>) attributes {dimension_semantics = [#tpu.dimension_semantics<parallel>, #tpu.dimension_semantics<arbitrary>], iteration_bounds = array<i64: 1, 2>, scalar_prefetch = 0 : i64, scratch_operands = 1 : i64, tpu.core_type = #tpu.core_type<tc>, window_params = [{transform_indices = @transform_0, window_bounds = array<i64: 2, 4, 128>}, {pipeline_mode = #tpu.pipeline_mode<synchronous>, transform_indices = @transform_1, window_bounds = array<i64: 4, 32, 1>}, {pipeline_mode = #tpu.pipeline_mode<synchronous>, transform_indices = @transform_2, window_bounds = array<i64: 32, 1>}, {pipeline_mode = #tpu.pipeline_mode<synchronous>, transform_indices = @transform_3, window_bounds = array<i64: 32, 128>}, {pipeline_mode = #tpu.pipeline_mode<synchronous>, transform_indices = @transform_4, window_bounds = array<i64: 1, 128>}, {transform_indices = @transform_5, window_bounds = array<i64: 2, 128>}]} {
    %c0_i32 = arith.constant 0 : i32
    %0 = arith.cmpi eq, %arg1, %c0_i32 : i32
    %1 = arith.extui %0 : i1 to i32
    %c0_i32_0 = arith.constant 0 : i32
    %2 = arith.cmpi ne, %1, %c0_i32_0 : i32
    scf.if %2 {
      %cst_20 = arith.constant 0.000000e+00 : f32
      %48 = vector.broadcast %cst_20 : f32 to vector<2x32xf32>
      %c0_21 = arith.constant 0 : index
      %c0_22 = arith.constant 0 : index
      %49 = vector.load %arg8[%c0_21, %c0_22] : memref<2x32xf32, #tpu.memory_space<vmem>>, vector<2x32xf32>
      tpu.vector_store %arg8[%c0_21, %c0_22], %48 {strides = array<i32>} : memref<2x32xf32, #tpu.memory_space<vmem>>, vector<2x32xf32>,
    } else {
    }
    %c0 = arith.constant 0 : index
    %c0_1 = arith.constant 0 : index
    %c0_2 = arith.constant 0 : index
    %3 = vector.load %arg2[%c0, %c0_1, %c0_2] : memref<2x4x128xf32, #tpu.memory_space<vmem>>, vector<2x4x128xf32>
    %c0_3 = arith.constant 0 : index
    %c0_4 = arith.constant 0 : index
    %c0_5 = arith.constant 0 : index
    %4 = vector.load %arg3[%c0_3, %c0_4, %c0_5] : memref<4x32x1xf32, #tpu.memory_space<vmem>>, vector<1x32x1xf32>
    %5 = vector.shape_cast %4 : vector<1x32x1xf32> to vector<32x1xf32>
    %6 = vector.shape_cast %5 : vector<32x1xf32> to vector<1x32x1xf32>
    %7 = vector.extract_strided_slice %3 {offsets = [0, 0, 0], sizes = [2, 1, 128], strides = [1, 1, 1]} : vector<2x4x128xf32> to vector<2x1x128xf32>
    %8 = vector.broadcast %6 : vector<1x32x1xf32> to vector<2x32x128xf32>
    %9 = vector.broadcast %7 : vector<2x1x128xf32> to vector<2x32x128xf32>
    %10 = arith.mulf %8, %9 : vector<2x32x128xf32>
    %c1 = arith.constant 1 : index
    %c0_6 = arith.constant 0 : index
    %c0_7 = arith.constant 0 : index
    %11 = vector.load %arg3[%c1, %c0_6, %c0_7] : memref<4x32x1xf32, #tpu.memory_space<vmem>>, vector<1x32x1xf32>
    %12 = vector.shape_cast %11 : vector<1x32x1xf32> to vector<32x1xf32>
    %13 = vector.shape_cast %12 : vector<32x1xf32> to vector<1x32x1xf32>
    %14 = vector.extract_strided_slice %3 {offsets = [0, 1, 0], sizes = [2, 1, 128], strides = [1, 1, 1]} : vector<2x4x128xf32> to vector<2x1x128xf32>
    %15 = vector.broadcast %13 : vector<1x32x1xf32> to vector<2x32x128xf32>
    %16 = vector.broadcast %14 : vector<2x1x128xf32> to vector<2x32x128xf32>
    %17 = arith.mulf %15, %16 : vector<2x32x128xf32>
    %18 = arith.addf %10, %17 : vector<2x32x128xf32>
    %c2 = arith.constant 2 : index
    %c0_8 = arith.constant 0 : index
    %c0_9 = arith.constant 0 : index
    %19 = vector.load %arg3[%c2, %c0_8, %c0_9] : memref<4x32x1xf32, #tpu.memory_space<vmem>>, vector<1x32x1xf32>
    %20 = vector.shape_cast %19 : vector<1x32x1xf32> to vector<32x1xf32>
    %21 = vector.shape_cast %20 : vector<32x1xf32> to vector<1x32x1xf32>
    %22 = vector.extract_strided_slice %3 {offsets = [0, 2, 0], sizes = [2, 1, 128], strides = [1, 1, 1]} : vector<2x4x128xf32> to vector<2x1x128xf32>
    %23 = vector.broadcast %21 : vector<1x32x1xf32> to vector<2x32x128xf32>
    %24 = vector.broadcast %22 : vector<2x1x128xf32> to vector<2x32x128xf32>
    %25 = arith.mulf %23, %24 : vector<2x32x128xf32>
    %26 = arith.addf %18, %25 : vector<2x32x128xf32>
    %c3 = arith.constant 3 : index
    %c0_10 = arith.constant 0 : index
    %c0_11 = arith.constant 0 : index
    %27 = vector.load %arg3[%c3, %c0_10, %c0_11] : memref<4x32x1xf32, #tpu.memory_space<vmem>>, vector<1x32x1xf32>
    %28 = vector.shape_cast %27 : vector<1x32x1xf32> to vector<32x1xf32>
    %29 = vector.shape_cast %28 : vector<32x1xf32> to vector<1x32x1xf32>
    %30 = vector.extract_strided_slice %3 {offsets = [0, 3, 0], sizes = [2, 1, 128], strides = [1, 1, 1]} : vector<2x4x128xf32> to vector<2x1x128xf32>
    %31 = vector.broadcast %29 : vector<1x32x1xf32> to vector<2x32x128xf32>
    %32 = vector.broadcast %30 : vector<2x1x128xf32> to vector<2x32x128xf32>
    %33 = arith.mulf %31, %32 : vector<2x32x128xf32>
    %34 = arith.addf %26, %33 : vector<2x32x128xf32>
    %c0_12 = arith.constant 0 : index
    %c0_13 = arith.constant 0 : index
    %35 = vector.load %arg4[%c0_12, %c0_13] : memref<32x1xf32, #tpu.memory_space<vmem>>, vector<32x1xf32>
    %36 = vector.shape_cast %35 : vector<32x1xf32> to vector<1x32x1xf32>
    %37 = vector.broadcast %36 : vector<1x32x1xf32> to vector<2x32x128xf32>
    %38 = arith.addf %34, %37 : vector<2x32x128xf32>
    %cst = arith.constant 0.000000e+00 : f32
    %39 = vector.broadcast %cst : f32 to vector<2x32x128xf32>
    %40 = arith.maximumf %38, %39 : vector<2x32x128xf32>
    %c0_14 = arith.constant 0 : index
    %c0_15 = arith.constant 0 : index
    %41 = vector.load %arg8[%c0_14, %c0_15] : memref<2x32xf32, #tpu.memory_space<vmem>>, vector<2x32xf32>
    %cst_16 = arith.constant dense<0.000000e+00> : vector<2x32xf32>
    %42 = vector.multi_reduction <add>, %40, %cst_16 [2] : vector<2x32x128xf32> to vector<2x32xf32>
    %43 = arith.addf %41, %42 : vector<2x32xf32>
    %c0_17 = arith.constant 0 : index
    %c0_18 = arith.constant 0 : index
    %44 = vector.load %arg8[%c0_17, %c0_18] : memref<2x32xf32, #tpu.memory_space<vmem>>, vector<2x32xf32>
    tpu.vector_store %arg8[%c0_17, %c0_18], %43 {strides = array<i32>} : memref<2x32xf32, #tpu.memory_space<vmem>>, vector<2x32xf32>,
    %c1_i32 = arith.constant 1 : i32
    %45 = arith.cmpi eq, %arg1, %c1_i32 : i32
    %46 = arith.extui %45 : i1 to i32
    %c0_i32_19 = arith.constant 0 : i32
    %47 = arith.cmpi ne, %46, %c0_i32_19 : i32
    scf.if %47 {
      %c0_20 = arith.constant 0 : index
      %c0_21 = arith.constant 0 : index
      %48 = vector.load %arg8[%c0_20, %c0_21] : memref<2x32xf32, #tpu.memory_space<vmem>>, vector<2x32xf32>
      %c0_22 = arith.constant 0 : index
      %c0_23 = arith.constant 0 : index
      %49 = vector.load %arg5[%c0_22, %c0_23] : memref<32x128xf32, #tpu.memory_space<vmem>>, vector<32x128xf32>
      %cst_24 = arith.constant dense<0.000000e+00> : vector<2x128xf32>
      %50 = tpu.matmul %48, %49, %cst_24 {dimension_numbers = #tpu.dot_dimension_numbers<[1], [0], [0], [1], [0, 0, 1, 1], [], []>} : vector<2x32xf32>, vector<32x128xf32>, vector<2x128xf32> -> vector<2x128xf32>
      %c0_25 = arith.constant 0 : index
      %c0_26 = arith.constant 0 : index
      %51 = vector.load %arg6[%c0_25, %c0_26] : memref<1x128xf32, #tpu.memory_space<vmem>>, vector<1x128xf32>
      %52 = vector.broadcast %51 : vector<1x128xf32> to vector<2x128xf32>
      %53 = arith.addf %50, %52 : vector<2x128xf32>
      %54 = arith.mulf %53, %53 : vector<2x128xf32>
      %cst_27 = arith.constant dense<0.000000e+00> : vector<2xf32>
      %55 = vector.multi_reduction <add>, %54, %cst_27 [1] : vector<2x128xf32> to vector<2xf32>
      %56 = vector.shape_cast %55 : vector<2xf32> to vector<2x1xf32>
      %cst_28 = arith.constant 9.99999996E-13 : f32
      %57 = vector.broadcast %cst_28 : f32 to vector<2x1xf32>
      %58 = arith.addf %56, %57 : vector<2x1xf32>
      %59 = math.rsqrt %58 : vector<2x1xf32>
      %60 = vector.broadcast %59 : vector<2x1xf32> to vector<2x128xf32>
      %61 = arith.mulf %53, %60 : vector<2x128xf32>
      %c0_29 = arith.constant 0 : index
      %c0_30 = arith.constant 0 : index
      %62 = vector.load %arg7[%c0_29, %c0_30] : memref<2x128xf32, #tpu.memory_space<vmem>>, vector<2x128xf32>
      tpu.vector_store %arg7[%c0_29, %c0_30], %61 {strides = array<i32>} : memref<2x128xf32, #tpu.memory_space<vmem>>, vector<2x128xf32>,
    } else {
    }
    return
  }
  func.func @transform_0(%arg0: i32, %arg1: i32) -> (i32, i32, i32) {
    %c0_i32 = arith.constant 0 : i32
    %c0_i32_0 = arith.constant 0 : i32
    return %arg0, %c0_i32, %arg1 : i32, i32, i32
  }
  func.func @transform_1(%arg0: i32, %arg1: i32) -> (i32, i32, i32) {
    %c0_i32 = arith.constant 0 : i32
    %c0_i32_0 = arith.constant 0 : i32
    %c0_i32_1 = arith.constant 0 : i32
    %c0_i32_2 = arith.constant 0 : i32
    return %c0_i32, %c0_i32_0, %c0_i32_1 : i32, i32, i32
  }
  func.func @transform_2(%arg0: i32, %arg1: i32) -> (i32, i32) {
    %c0_i32 = arith.constant 0 : i32
    %c0_i32_0 = arith.constant 0 : i32
    %c0_i32_1 = arith.constant 0 : i32
    return %c0_i32, %c0_i32_0 : i32, i32
  }
  func.func @transform_3(%arg0: i32, %arg1: i32) -> (i32, i32) {
    %c0_i32 = arith.constant 0 : i32
    %c0_i32_0 = arith.constant 0 : i32
    %c0_i32_1 = arith.constant 0 : i32
    return %c0_i32, %c0_i32_0 : i32, i32
  }
  func.func @transform_4(%arg0: i32, %arg1: i32) -> (i32, i32) {
    %c0_i32 = arith.constant 0 : i32
    %c0_i32_0 = arith.constant 0 : i32
    %c0_i32_1 = arith.constant 0 : i32
    return %c0_i32, %c0_i32_0 : i32, i32
  }
  func.func @transform_5(%arg0: i32, %arg1: i32) -> (i32, i32) {
    %c0_i32 = arith.constant 0 : i32
    %c0_i32_0 = arith.constant 0 : i32
    return %arg0, %c0_i32 : i32, i32
  }
}

</mosaic_0001>

<bundles_post_ra>
// kernel: tpu_custom_call.1
= control target key start
LH: loop header
LB: loop body
LE: loop exit
PB: predicated region body
PF: predicated region fallthrough
CT: control target
= control target key end

     0   :  { %10 = vsyncpa [#allocation5], 0  ;;  %s855_s18 = smov 0   ;;  %s857_s19 = smov 0   ;;  %s1064_s0 = inlined_call_operand.vmem [shape: f32[2,4,256], index: 0, kind: input, shape index: {}]   ;;  %s1065_s1 = inlined_call_operand.vmem [shape: f32[4,32,1], index: 1, kind: input, shape index: {}]   ;;  %s1066_s2 = inlined_call_operand.vmem [shape: f32[32,1], index: 2, kind: input, shape index: {}]   ;;  %s1067_s3 = inlined_call_operand.vmem [shape: f32[32,128], index: 3, kind: input, shape index: {}]   ;;  %s1068_s4 = inlined_call_operand.vmem [shape: f32[1,128], index: 4, kind: input, shape index: {}]   ;;  %s1069_s5 = inlined_call_operand.hbm [shape: f32[2,128], index: 5, kind: output, shape index: {}]  }
   0x1   :  { %s859_s20 = smov 0   ;;  %s861_s21 = smov 0  }
   0x2   :  { %s863_s22 = smov 0  }
   0x3 LB: > { %s669_s23 = sadd.s32 4294967295, %s820_s22   ;;  %s25_s24 = sadd.s32 1, %s816_s21  ;;  %s820_s22 = sphi %s863_s22, %s16_s22   ;;  %s816_s21 = sphi %s861_s21, %s1073_s21   ;;  %s812_s20 = sphi %s859_s20, %s1072_s20   ;;  %s808_s19 = sphi %s857_s19, %s1071_s19   ;;  %s804_s18 = sphi %s855_s18, %s1070_s18  }
   0x4   : > { %p26_p0 = scmp.ge.s32.totalorder %s25_s24, 2  ;;  %p44_p1 = scmp.ne.s32.totalorder %s808_s19, %s804_s18 }
   0x5   : > { %p45_p2 = scmp.eq.s32.totalorder %s820_s22, 0  ;;  %s37_s26 = sadd.s32 1, %s808_s19 }
   0x6   : > { %s1075_s24 = smov (%p26_p0, %s25_s24), 0  ;;  %p671_p5 = scmp.ge.s32.totalorder %s820_s22, 2 }
   0x7   : > { %p46_p3 = por %p45_p2, %p44_p1  ;;  %s33_s25 = ssub.s32 %s816_s21, %s1075_s24 }
   0x8   : > { %p35_p4 = scmp.eq.s32.totalorder %s33_s25, 0  ;;  %192 = sbr.rel (%p671_p5) target bundleno = 19 (0x13), region = 32 }
   0xa   : > { %s891_s27 = scalar_select %p35_p4, %s808_s19, %s37_s26  }
   0xd   : > { %195 = sbr.rel (!%p46_p3) target bundleno = 19 (0x13), region = 36  ;;  %s197_s28 = sand.u32 (%p46_p3), 1, %s808_s19  }
   0xe   : > { %s673_s29 = sshll.u32 (%p46_p3), %s816_s21, 2  ;;  %s672_s30 = sshll.u32 (%p46_p3), %s197_s28, 3 }
   0xf   : > { %s204_s8 = scalar_lea.vmem (%p46_p3), %s1064_s0, %s673_s29  ;;  %s199_s9 = scalar_lea.vmem (%p46_p3), [#allocation3], %s672_s30 }
  0x10   : > { %v221_v0 = vld [vmem:[%s204_s8] sm:$0xf] (%p46_p3)  ;;  %v223_v1 = vld [vmem:[%s204_s8 + $0x8] sm:$0xf] (%p46_p3) }
  0x11   : > { %222 = vst [vmem:[%s199_s9] sm:$0xf] (%p46_p3), %v221_v0 }
  0x12   : > { %224 = vst [vmem:[%s199_s9 + $0x4] sm:$0xf] %v223_v1 }
  0x13 PF: > { %p674_p6 = scmp.ge.s32.totalorder %s820_s22, 1  ;;  %p251_p7 = scmp.lt.s32.totalorder %s820_s22, 3 }
  0x15   : > { %p252_p8 = pnand %p674_p6, %p251_p7 }
  0x16   : > { %s258_s10 = sand.u32 (!%p252_p8), 1, %s804_s18   ;;  %p676_p9 = scmp.ne.s32.totalorder (!%p252_p8), %s812_s20, 0 }
  0x17   : > { %255 = sbr.rel (%p252_p8) target bundleno = 629 (0x275), region = 77  ;;  %s902_s11 = sshll.u32 (!%p252_p8), %s258_s10, 3 }
  0x18   : > { %s260_s12 = scalar_lea.vmem (!%p252_p8), [#allocation3], %s902_s11 }
  0x1c   : > { %284 = sbr.rel (%p676_p9) target bundleno = 35 (0x23), region = 85 }
  0x21   : > { %vm285_vm0 = vcmask 254976   ;;  %v822_v2 = vmov 0.0  }
  0x22   : > { %286 = vst.msk [vmem:[#allocation2] sm:$0x3] %vm285_vm0, %v822_v2 }
  0x23 PF: > { %v677_v3 = vld [vmem:[%s1065_s1 + $0x20] sm:$0xff]  ;;  %v291_v4 = vld [vmem:[%s1065_s1 + $0x10] sm:$0xff]  ;;  %v823_v6 = vmov 0   ;;  %v678_v7 = vld [vmem:[%s1065_s1 + $0x28] sm:$0xff]  ;;  %vm522_vm1 = vcmask 130112   ;;  %vm526_vm2 = vcmask 195712  }
  0x24   : > { %v289_v5 = vld [vmem:[%s1065_s1] sm:$0xff]  ;;  %746 = vset.pattern.permute.xlu2 %v823_v6  ;;  %745 = vset.pattern.permute.xlu1 %v823_v6  ;;  %v292_v8 = vld [vmem:[%s1065_s1 + $0x18] sm:$0xff]  ;;  %v290_v9 = vld [vmem:[%s1065_s1 + $0x8] sm:$0xff]  ;;  %vm530_vm3 = vcmask 261312   ;;  %vm539_vm4 = vcmask 1041409   ;;  %vm543_vm5 = vcmask 254976  }
  0x25   : > { %744 = vset.pattern.permute.xlu0 %v823_v6  ;;  %330 = vperm.xlu2 %746, %v677_v3   ;;  %v681_v10 = vld [vmem:[%s1065_s1 + $0x40] sm:$0xff]  ;;  %v680_v11 = vld [vmem:[%s1065_s1 + $0x38] sm:$0xff]  ;;  %v679_v12 = vld [vmem:[%s1065_s1 + $0x30] sm:$0xff]  ;;  %p689_p10 = scmp.ne.s32.totalorder %s812_s20, 1 }
  0x26   : > { %305 = vperm.xlu1 %745, %v291_v4   ;;  %295 = vperm.xlu0 %744, %v289_v5   ;;  %v684_v13 = vld [vmem:[%s1065_s1 + $0x58] sm:$0xff]  ;;  %v683_v14 = vld [vmem:[%s1065_s1 + $0x50] sm:$0xff]  ;;  %v682_v15 = vld [vmem:[%s1065_s1 + $0x48] sm:$0xff] }
  0x27   : > { %v687_v16 = vld [vmem:[%s1065_s1 + $0x70] sm:$0xff]  ;;  %v686_v17 = vld [vmem:[%s1065_s1 + $0x68] sm:$0xff]  ;;  %v685_v18 = vld [vmem:[%s1065_s1 + $0x60] sm:$0xff] }
  0x28   : > { %v453_v19 = vld [vmem:[%s1066_s2 + $0x8] sm:$0xff]  ;;  %v452_v20 = vld [vmem:[%s1066_s2] sm:$0xff]  ;;  %v688_v21 = vld [vmem:[%s1065_s1 + $0x78] sm:$0xff] }
  0x29   : > { %v455_v22 = vld [vmem:[%s1066_s2 + $0x18] sm:$0xff]  ;;  %v454_v23 = vld [vmem:[%s1066_s2 + $0x10] sm:$0xff]  ;;  %v287_v34 = vld [vmem:[%s260_s12] sm:$0xf] }
  0x2a   : > { %v288_v35 = vld [vmem:[%s260_s12 + $0x4] sm:$0xf]  ;;  %v348_v36 = vperm.slane %v287_v34, 1  ;;  %v313_v40 = vperm.slane %v287_v34, 0  ;;  %v391_v43 = vperm.slane %v287_v34, 2  ;;  %v992_v52 = vperm.slane %v287_v34, 3 }
  0x2b   : > { %v982_v39 = vperm.slane %v288_v35, 1  ;;  %v986_v44 = vperm.slane %v288_v35, 0  ;;  %v989_v49 = vperm.slane %v288_v35, 2  ;;  %v994_v56 = vperm.slane %v288_v35, 3 }
  0x2d   : > { %335 = vperm.xlu2 %746, %v678_v7  }
  0x2e   : > { %310 = vperm.xlu1 %745, %v292_v8   ;;  %300 = vperm.xlu0 %744, %v290_v9  }
  0x35   : > { %373 = vperm.xlu2 %746, %v681_v10  }
  0x36   : > { %345 = vperm.xlu1 %745, %v680_v11   ;;  %340 = vperm.xlu0 %744, %v679_v12  }
  0x3d   : > { %388 = vperm.xlu2 %746, %v684_v13  }
  0x3e   : > { %383 = vperm.xlu1 %745, %v683_v14   ;;  %378 = vperm.xlu0 %744, %v682_v15  }
  0x45   : > { %426 = vperm.xlu2 %746, %v687_v16  }
  0x46   : > { %421 = vperm.xlu1 %745, %v686_v17   ;;  %416 = vperm.xlu0 %744, %v685_v18  }
  0x4d   : > { %463 = vperm.xlu2 %746, %v453_v19  }
  0x4e   : > { %458 = vperm.xlu1 %745, %v452_v20   ;;  %431 = vperm.xlu0 %744, %v688_v21  }
  0x56   : > { %473 = vperm.xlu1 %745, %v455_v22   ;;  %468 = vperm.xlu0 %744, %v454_v23  }
  0x7f   : > { %v331_v24 = vpop.permute.xlu2 %330 }
  0x80   : > { %v350_v46 = vmul.f32 %v348_v36, %v331_v24  ;;  %v354_v48 = vmul.f32 %v982_v39, %v331_v24 }
  0x87   : > { %v336_v25 = vpop.permute.xlu2 %335 }
  0x88   : > { %v351_v42 = vmul.f32 %v348_v36, %v336_v25  ;;  %v355_v2 = vmul.f32 %v982_v39, %v336_v25 }
  0x8f   : > { %v374_v28 = vpop.permute.xlu2 %373 }
  0x90   : > { %v393_v54 = vmul.f32 %v391_v43, %v374_v28  ;;  %v397_v59 = vmul.f32 %v989_v49, %v374_v28 }
  0x97   : > { %v970_v31 = vpop.permute.xlu2 %388 }
  0x98   : > { %v966_v26 = vpop.permute.xlu1 %305  ;;  %v296_v27 = vpop.permute.xlu0 %295  ;;  %v396_v25 = vmul.f32 %v391_v43, %v970_v31 }
  0x99   : > { %v315_v47 = vmul.f32 %v313_v40, %v296_v27  ;;  %v319_v50 = vmul.f32 %v986_v44, %v296_v27  ;;  %v321_v10 = vmul.f32 %v986_v44, %v966_v26 }
  0x9b   : > { %v358_v55 = vadd.f32 %v350_v46, %v315_v47  ;;  %v362_v60 = vadd.f32 %v354_v48, %v319_v50  ;;  %v317_v47 = vmul.f32 %v313_v40, %v966_v26 }
  0x9d   : > { %v401_v5 = vadd.f32 %v393_v54, %v358_v55  ;;  %v405_v8 = vadd.f32 %v397_v59, %v362_v60 }
  0x9f   : > { %v984_v41 = vpop.permute.xlu2 %426 }
  0xa0   : > { %v968_v29 = vpop.permute.xlu1 %310  ;;  %v301_v30 = vpop.permute.xlu0 %300 }
  0xa1   : > { %v316_v45 = vmul.f32 %v313_v40, %v301_v30  ;;  %v320_v3 = vmul.f32 %v986_v44, %v301_v30  ;;  %v318_v11 = vmul.f32 %v313_v40, %v968_v29 }
  0xa3   : > { %v359_v53 = vadd.f32 %v351_v42, %v316_v45  ;;  %v363_v17 = vadd.f32 %v355_v2, %v320_v3  ;;  %v442_v45 = vmul.f32 %v994_v56, %v984_v41 }
  0xa7   : > { %v464_v4 = vpop.permute.xlu2 %463 }
  0xa8   : > { %v972_v32 = vpop.permute.xlu1 %345  ;;  %v974_v33 = vpop.permute.xlu0 %340 }
  0xa9   : > { %v353_v6 = vmul.f32 %v348_v36, %v972_v32  ;;  %v356_v7 = vmul.f32 %v982_v39, %v974_v33 }
  0xab   : > { %v361_v21 = vadd.f32 %v353_v6, %v318_v11  ;;  %v364_v22 = vadd.f32 %v356_v7, %v321_v10 }
  0xad   : > { %v404_v46 = vadd.f32 %v396_v25, %v361_v21 }
  0xb0   : > { %v980_v37 = vpop.permute.xlu1 %383  ;;  %v379_v38 = vpop.permute.xlu0 %378 }
  0xb1   : > { %v394_v51 = vmul.f32 %v391_v43, %v379_v38  ;;  %v398_v12 = vmul.f32 %v989_v49, %v379_v38  ;;  %v399_v13 = vmul.f32 %v989_v49, %v980_v37  ;;  %v352_v38 = vmul.f32 %v348_v36, %v974_v33 }
  0xb2   : > { %v395_v48 = vmul.f32 %v391_v43, %v980_v37  ;;  %v322_v37 = vmul.f32 %v986_v44, %v968_v29 }
  0xb3   : > { %v402_v61 = vadd.f32 %v394_v51, %v359_v53  ;;  %v406_v27 = vadd.f32 %v398_v12, %v363_v17  ;;  %v407_v28 = vadd.f32 %v399_v13, %v364_v22  ;;  %v360_v53 = vadd.f32 %v352_v38, %v317_v47  ;;  %v492_v22 = vld [vmem:[#allocation2] sm:$0x3] }
  0xb5   : > { %v450_v51 = vadd.f32 %v442_v45, %v407_v28  ;;  %v403_v33 = vadd.f32 %v395_v48, %v360_v53 }
  0xb8   : > { %v422_v57 = vpop.permute.xlu1 %421  ;;  %v417_v58 = vpop.permute.xlu0 %416 }
  0xb9   : > { %v437_v62 = vmul.f32 %v992_v52, %v422_v57  ;;  %v436_v0 = vmul.f32 %v992_v52, %v417_v58  ;;  %v440_v1 = vmul.f32 %v994_v56, %v417_v58  ;;  %v441_v18 = vmul.f32 %v994_v56, %v422_v57 }
  0xbb   : > { %v445_v63 = vadd.f32 %v437_v62, %v402_v61  ;;  %v444_v14 = vadd.f32 %v436_v0, %v401_v5  ;;  %v448_v15 = vadd.f32 %v440_v1, %v405_v8  ;;  %v449_v42 = vadd.f32 %v441_v18, %v406_v27 }
  0xbc   : > { %v438_v61 = vmul.f32 %v992_v52, %v984_v41  ;;  %v357_v62 = vmul.f32 %v982_v39, %v972_v32  ;;  %v400_v0 = vmul.f32 %v989_v49, %v970_v31  ;;  %v517_v5 = vlaneseq }
  0xbd   : > { %v477_v9 = vadd.f32 %v464_v4, %v445_v63  ;;  %v481_v57 = vadd.f32 %v464_v4, %v449_v42 }
  0xbe   : > { %v446_v40 = vadd.f32 %v438_v61, %v403_v33  ;;  %v365_v43 = vadd.f32 %v357_v62, %v322_v37  ;;  %v518_v6 = vand.u32 127, %v517_v5 }
  0xbf   : > { %v485_v16 = vmax.f32 %v477_v9, 0.0  ;;  %v489_v26 = vmax.f32 %v481_v57, 0.0 }
  0xc0   : > { %v459_v19 = vpop.permute.xlu1 %458  ;;  %v432_v20 = vpop.permute.xlu0 %431  ;;  %v408_v2 = vadd.f32 %v400_v0, %v365_v43  ;;  %v520_v8 = vadd.s32 4294967288, %v518_v6  ;;  %v524_v9 = vadd.s32 4294967280, %v518_v6  ;;  %v528_v13 = vadd.s32 4294967272, %v518_v6 }
  0xc1   : > { %v476_v23 = vadd.f32 %v459_v19, %v444_v14  ;;  %v480_v24 = vadd.f32 %v459_v19, %v448_v15  ;;  %495 = vadd.xlane.f32.xlu0 %v485_v16  ;;  %v439_v30 = vmul.f32 %v992_v52, %v432_v20  ;;  %v443_v1 = vmul.f32 %v994_v56, %v432_v20 }
  0xc3   : > { %v488_v34 = vmax.f32 %v480_v24, 0.0  ;;  %v484_v35 = vmax.f32 %v476_v23, 0.0  ;;  %v447_v50 = vadd.f32 %v439_v30, %v404_v46  ;;  %v451_v52 = vadd.f32 %v443_v1, %v408_v2 }
  0xc5   : > { %501 = vadd.xlane.f32.xlu1 %v488_v34  ;;  %493 = vadd.xlane.f32.xlu2 %v484_v35 }
  0xc8   : > { %v474_v54 = vpop.permute.xlu1 %473  ;;  %v469_v55 = vpop.permute.xlu0 %468 }
  0xc9   : > { %v479_v58 = vadd.f32 %v474_v54, %v447_v50  ;;  %v482_v59 = vadd.f32 %v469_v55, %v450_v51  ;;  %v478_v63 = vadd.f32 %v469_v55, %v446_v40  ;;  %v483_v32 = vadd.f32 %v474_v54, %v451_v52 }
  0xcb   : > { %v487_v36 = vmax.f32 %v479_v58, 0.0  ;;  %v490_v60 = vmax.f32 %v482_v59, 0.0  ;;  %v486_v41 = vmax.f32 %v478_v63, 0.0  ;;  %v491_v39 = vmax.f32 %v483_v32, 0.0 }
  0xcd   : > { %499 = vadd.xlane.f32.xlu1 %v487_v36  ;;  %505 = vadd.xlane.f32.xlu0 %v490_v60 }
  0xce   : > { %503 = vadd.xlane.f32.xlu2 %v489_v26 }
  0xd6   : > { %497 = vadd.xlane.f32.xlu2 %v486_v41 }
  0xde   : > { %507 = vadd.xlane.f32.xlu2 %v491_v39 }
 0x134   : > { %v496_v29 = vpop.xlane.xlu0 %495 }
 0x135   : > { %v521_v11 = vperm.slane %v496_v29, %v520_v8 }
 0x138   : > { %v494_v3 = vpop.xlane.xlu2 %493  ;;  %v502_v44 = vpop.xlane.xlu1 %501 }
 0x139   : > { %v519_v10 = vperm.slane %v494_v3, %v518_v6  ;;  %v532_v12 = vperm.slane %v502_v44, %v518_v6 }
 0x13b   : > { %v523_v16 = vsel %vm522_vm1, %v521_v11, %v519_v10 }
 0x140   : > { %v506_v31 = vpop.xlane.xlu0 %505  ;;  %v500_v14 = vpop.xlane.xlu1 %499 }
 0x141   : > { %v504_v4 = vpop.xlane.xlu2 %503  ;;  %v535_v15 = vperm.slane %v506_v31, %v524_v9  ;;  %v529_v20 = vperm.slane %v500_v14, %v528_v13 }
 0x142   : > { %v533_v49 = vperm.slane %v504_v4, %v520_v8 }
 0x144   : > { %v534_v17 = vsel %vm522_vm1, %v533_v49, %v532_v12 }
 0x145   : > { %v536_v23 = vsel %vm526_vm2, %v535_v15, %v534_v17 }
 0x149   : > { %v498_v7 = vpop.xlane.xlu2 %497 }
 0x14a   : > { %v525_v56 = vperm.slane %v498_v7, %v524_v9 }
 0x14c   : > { %v527_v18 = vsel %vm526_vm2, %v525_v56, %v523_v16 }
 0x14d   : > { %v531_v24 = vsel %vm530_vm3, %v529_v20, %v527_v18 }
 0x151   : > { %v508_v19 = vpop.xlane.xlu2 %507 }
 0x152   : > { %v537_v21 = vperm.slane %v508_v19, %v528_v13 }
 0x154   : > { %v538_v25 = vsel %vm530_vm3, %v537_v21, %v536_v23  ;;  %548 = sbr.rel (%p689_p10) target bundleno = 623 (0x26f), region = 89 }
 0x155   : > { %v540_v27 = vsel %vm539_vm4, %v538_v25, %v531_v24 }
 0x156   : > { %v542_v28 = vadd.f32 %v540_v27, %v492_v22 }
 0x158   : > { %544 = vst.msk [vmem:[#allocation2] sm:$0x3] %vm543_vm5, %v542_v28 }
 0x159   : > { %v553_v30 = vld [vmem:[%s1067_s3 + $0x18] sm:$0xff]  ;;  %v552_v34 = vld [vmem:[%s1067_s3 + $0x10] sm:$0xff]  ;;  %v551_v35 = vld [vmem:[%s1067_s3 + $0x8] sm:$0xff]  ;;  %vm558_vm6 = vcmask 261120   ;;  %vm583_vm7 = vcmask 1041408  }
 0x15a   : > { %574 = vmatpush.msra.mxu0 %v553_v30  ;;  %v550_v38 = vld [vmem:[%s1067_s3] sm:$0xff] }
 0x15b   : > { %v747_v45 = vld [vmem:[%s1068_s4] ss:$0 sm:$0xff] }
 0x15c   : > { %575 = vmatpush.msra.mxu0 %v552_v34 }
 0x15e   : > { %576 = vmatpush.msra.mxu0 %v551_v35 }
 0x15f   : > { %v549_v42 = vld [vmem:[#allocation2] sm:$0x3] }
 0x160   : > { %577 = vmatpush.msra.mxu0 %v550_v38 }
 0x161   : > { %690 = vmatmul.msk.f32.vlgmr.msra.gmra.mxu0 %vm558_vm6, %v549_v42 }
 0x1de   : > { %v579_v46 = vpop.f32.mrf.mxu0 }
 0x1df   : > { %v580_v47 = vadd.f32 %v747_v45, %v579_v46 }
 0x1e1   : > { %v582_v48 = vmul.f32 %v580_v47, %v580_v47 }
 0x1e3   : > { %v584_v50 = vsel %vm583_vm7, %v582_v48, 0.0 }
 0x1e4   : > { %585 = vadd.xlane.f32.xlu0 %v584_v50 }
 0x257   : > { %v586_v51 = vpop.xlane.xlu0 %585 }
 0x258   : > { %v587_v53 = vadd.f32 1e-12, %v586_v51 }
 0x25a   : > { %748 = vrsqrt.f32 %v587_v53  ;;  %vm594_vm9 = vweird.f32 %v587_v53 }
 0x260   : > { %v749_v54 = vpop.eup %748 }
 0x261   : > { %v589_v55 = vmul.f32 %v749_v54, %v587_v53  ;;  %vm595_vm8 = vweird.f32 %v749_v54 }
 0x262   : > { %vm596_vm10 = vmor %vm594_vm9, %vm595_vm8 }
 0x263   : > { %v590_v57 = vmul.f32 %v749_v54, %v589_v55 }
 0x265   : > { %v591_v58 = vmul.f32 0.5, %v590_v57 }
 0x267   : > { %v592_v59 = vsub.f32 1.5, %v591_v58 }
 0x269   : > { %v593_v33 = vmul.f32 %v749_v54, %v592_v59 }
 0x26b   : > { %v597_v36 = vsel %vm596_vm10, %v749_v54, %v593_v33 }
 0x26c   : > { %v598_v60 = vmul.f32 %v597_v36, %v580_v47 }
 0x26e   : > { %599 = vst [vmem:[#allocation4] sm:$0x3] %v598_v60 }
 0x26f PF: > { %p699_p11 = scmp.eq.s32.totalorder %s669_s23, 1  ;;  %s610_s14 = sshll.u32 %s1069_s5, 4  ;;  %s611_s14 = int_to_ptr.hbm [resolvable:$true] %s610_s14 }
 0x270   : > { %s824_s15 = smov [#allocation4]  }
 0x271   : > { %s608_s16 = sshll.u32 %s824_s15, 4  ;;  %s609_s16 = int_to_ptr.vmem [resolvable:$true] %s608_s16 }
 0x272   : > { %696 = dma.vmem_to_hbm [thread:$0]  (%p699_p11), %s609_s16, 32, %s611_s14, [#allocation5]  }
 0x273   : > { %799 = dma.done.wait (%p699_p11), [#allocation5], 32  }
 0x274   : > { %801 = vsyncadd (%p699_p11), [#allocation5], 4294967264 }
 0x275 PF: > { %s16_s22 = sadd.s32 1, %s820_s22   ;;  %s1070_s18 = smov %s808_s19 }
 0x276   : > { %p13_p12 = scmp.ge.s32.totalorder %s16_s22, 4   ;;  %s1071_s19 = smov %s891_s27 }
 0x277   : > { %s1072_s20 = smov %s816_s21  ;;  %s1073_s21 = smov %s1075_s24 }
 0x278   :  { %15 = sbr.rel (!%p13_p12) target bundleno = 3 (0x3), region = 125 }
 0x27d   :  { %624 = vsyncpa [#allocation5], 1 }
 0x27e   :  { %626 = vsyncpa [#allocation5 + $0x1], 1 }

</bundles_post_ra>
